<compile_context>
chip_gen: v7x
topology: tpu7x:2x2x1
jax: 0.10.0
libtpu: 0.0.40
codegen_flags: <defaults>
</compile_context>

<pallas_src>
import jax
import jax.numpy as jnp
from jax import lax
from jax.experimental import pallas as pl
from jax.experimental.pallas import tpu as pltpu


# Single-buffer request for VMEM-resident (never-changing) blocks; fall back to
# the default double-buffered spec on older jax without pipeline_mode support.
_SINGLE_BUFFER = {"pipeline_mode": pl.Buffered(1)} if hasattr(pl, "Buffered") else {}


def _mf_kernel(idx_ref, u_ref, a_ref, out_ref):
    # idx_ref: (2, TB)  int32    row 0 = user ids, row 1 = artist ids (lane-dense)
    # u_ref:   (FP, NU) bfloat16 [U^T ; ub^T ; 1 ; 0-pad]   (VMEM-resident)
    # a_ref:   (FP, NA) bfloat16 [A^T ; 1 ; ab^T ; 0-pad]   (VMEM-resident)
    # out_ref: (1, TB)  float32  lane-dense result row
    nu = u_ref.shape[1]
    na = a_ref.shape[1]
    tb = idx_ref.shape[1]

    users = idx_ref[0:1, :]      # (1, TB)
    artists = idx_ref[1:2, :]    # (1, TB)

    # One-hot selectors built on the VPU (iota + compare); the row gather is a
    # single bf16 MXU matmul per table (single pass), so gathered activations
    # stay in vregs/VMEM and never touch HBM. The one-hot is exact in bf16;
    # only the ~1e-2-magnitude table values see bf16 rounding (~4e-5 abs).
    oh_u = (lax.broadcasted_iota(jnp.int32, (nu, tb), 0) == users).astype(u_ref.dtype)
    oh_a = (lax.broadcasted_iota(jnp.int32, (na, tb), 0) == artists).astype(a_ref.dtype)

    us_t = jnp.dot(u_ref[...], oh_u, preferred_element_type=jnp.float32)   # (FP, TB)
    art_t = jnp.dot(a_ref[...], oh_a, preferred_element_type=jnp.float32)  # (FP, TB)

    # Augmented-feature trick: the extra feature rows carry (ub, 1) and (1, ab),
    # so this sublane reduce yields dp + ub + ab directly, already lane-dense
    # for the (1, TB) store.
    out_ref[...] = jnp.sum(us_t * art_t, axis=0, keepdims=True)


def prepare_recommender_tables(u_w, a_w, ub_w, ab_w, *, table_dtype=jnp.bfloat16):
    """Build the augmented, transposed, padded tables ONCE (cache across calls).

    u_w: (NU, F), a_w: (NA, F), ub_w: (NU, 1), ab_w: (NA, 1).
    Returns (u_aug_t, a_aug_t) with shape (fa_pad, NU) / (fa_pad, NA) such that
      sum_f u_aug_t[f, u] * a_aug_t[f, a] == U[u]·A[a] + ub[u] + ab[a].
    """
    nu, F = u_w.shape
    na, _ = a_w.shape
    fa = F + 2
    # bf16 packs 2 rows per sublane -> pad feature rows to a multiple of 16
    # (8 suffices for 32-bit table dtypes).
    sub = 16 if jnp.dtype(table_dtype).itemsize == 2 else 8
    fa_pad = sub * pl.cdiv(fa, sub)

    def _aug(tbl, extra0, extra1):
        aug = jnp.concatenate([tbl, extra0, extra1], axis=1).astype(jnp.float32)
        aug = jnp.pad(aug, ((0, 0), (0, fa_pad - fa)))
        return aug.T.astype(table_dtype)          # (fa_pad, rows)

    u_aug_t = _aug(u_w, ub_w, jnp.ones((nu, 1), jnp.float32))   # [U^T; ub^T; 1; 0]
    a_aug_t = _aug(a_w, jnp.ones((na, 1), jnp.float32), ab_w)   # [A^T; 1; ab^T; 0]
    return u_aug_t, a_aug_t


def recommender_forward(cats, conts, u_aug_t, a_aug_t, *, tb=8192):
    """Fused MF forward on pre-augmented tables.

    cats: (B, 2) int (user id, artist id); conts is unused (as in the module).
    u_aug_t: (fa_pad, NU), a_aug_t: (fa_pad, NA) from prepare_recommender_tables.
    Returns (B,) float32.
    """
    del conts  # the PyTorch forward ignores conts as well
    B = cats.shape[0]
    fa_pad, nu = u_aug_t.shape
    _, na = a_aug_t.shape

    # Batch tile: lane-dense (multiple of 128), capped, and sized so the grid
    # keeps >= 4 steps when the batch allows (2 v7x cores x >= 2 steps each).
    tb_cap = max(128, (int(tb) // 128) * 128)
    bp128 = 128 * pl.cdiv(max(B, 1), 128)
    tile = min(tb_cap, max(128, 128 * pl.cdiv(bp128 // 128, 4)))
    bp = tile * pl.cdiv(B, tile)

    # Pad batch up with id 0 (a valid row -- padded results are sliced off).
    idx = jnp.stack([cats[:, 0], cats[:, 1]], axis=0).astype(jnp.int32)   # (2, B)
    if bp != B:
        idx = jnp.pad(idx, ((0, 0), (0, bp - B)))

    # Scoped-VMEM budget: single-buffered tables + double-buffered id/out
    # streams + in-kernel intermediates (one-hots, gathered slabs), with 2x
    # headroom; capped at the v7x physical 64 MiB.
    elt = u_aug_t.dtype.itemsize
    table_bytes = (u_aug_t.size + a_aug_t.size) * elt
    stream_bytes = 2 * (2 * tile * 4 + tile * 4)
    interm_bytes = (nu + na) * tile * elt + 2 * fa_pad * tile * 4
    vmem_limit = int(min(64 << 20,
                         max(32 << 20, 2 * (table_bytes + stream_bytes + interm_bytes))))

    out = pl.pallas_call(
        _mf_kernel,
        out_shape=jax.ShapeDtypeStruct((1, bp), jnp.float32),
        grid=(bp // tile,),
        in_specs=[
            # (2, tile): dim -2 equals the full array dim (2), dim -1 is a
            # multiple of 128 -> satisfies the block-shape rule.
            pl.BlockSpec((2, tile), lambda i: (0, i)),                      # per-tile ids
            pl.BlockSpec((fa_pad, nu), lambda i: (0, 0), **_SINGLE_BUFFER),  # user table
            pl.BlockSpec((fa_pad, na), lambda i: (0, 0), **_SINGLE_BUFFER),  # artist table
        ],
        out_specs=pl.BlockSpec((1, tile), lambda i: (0, i)),                # lane-dense out
        compiler_params=pltpu.CompilerParams(
            dimension_semantics=("parallel",),   # megacore-shard batch tiles (v7x)
            vmem_limit_bytes=vmem_limit,
        ),
    )(idx, u_aug_t, a_aug_t)

    return out[0, :B]   # matches dp + ub.squeeze() + ab.squeeze()  -> (B,)


if __name__ == "__main__":
    # Synthetic, deterministic parameters (nn.Embedding weights ~ U(-0.01, 0.01)).
    num_users, num_artists, num_factors = 64, 48, 32
    batch = 8

    key = jax.random.PRNGKey(0)
    k_u, k_a, k_ub, k_ab, k_cu, k_ca = jax.random.split(key, 6)

    u_w = jax.random.uniform(k_u, (num_users, num_factors), jnp.float32, -0.01, 0.01)
    a_w = jax.random.uniform(k_a, (num_artists, num_factors), jnp.float32, -0.01, 0.01)
    ub_w = jax.random.uniform(k_ub, (num_users, 1), jnp.float32, -0.01, 0.01)
    ab_w = jax.random.uniform(k_ab, (num_artists, 1), jnp.float32, -0.01, 0.01)

    cats = jnp.stack(
        [
            jax.random.randint(k_cu, (batch,), 0, num_users, jnp.int32),
            jax.random.randint(k_ca, (batch,), 0, num_artists, jnp.int32),
        ],
        axis=1,
    )  # (B, 2)
    conts = jnp.zeros((batch, 3), jnp.float32)  # unused by the forward, as in PyTorch

    # One-time table preparation (cache these across forward calls).
    u_aug_t, a_aug_t = prepare_recommender_tables(u_w, a_w, ub_w, ab_w)
    u_aug_t, a_aug_t = jax.block_until_ready((u_aug_t, a_aug_t))

    out = recommender_forward(cats, conts, u_aug_t, a_aug_t)
    out = jax.block_until_ready(out)

    # Pure-JAX f32 reference. Tolerance covers bf16 rounding of the ~1e-2
    # magnitude table/bias values (worst case ~1e-4 abs on the result).
    users, artists = cats[:, 0], cats[:, 1]
    ref = (u_w[users] * a_w[artists]).sum(1) + ub_w[users][:, 0] + ab_w[artists][:, 0]
    assert out.shape == (batch,)
    assert jnp.allclose(out, ref, atol=3e-4, rtol=1e-3), (out, ref)

    print("KERNEL_OK")
</pallas_src>

<mosaic_0001>
module attributes {stable_mosaic.version = 11 : i64} {
  func.func @_mf_kernel(%arg0: i32, %arg1: memref<2x128xi32, #tpu.memory_space<vmem>>, %arg2: memref<48x64xbf16, #tpu.memory_space<vmem>>, %arg3: memref<48x48xbf16, #tpu.memory_space<vmem>>, %arg4: memref<1x128xf32, #tpu.memory_space<vmem>>) attributes {dimension_semantics = [#tpu.dimension_semantics<parallel>], iteration_bounds = array<i64: 1>, scalar_prefetch = 0 : i64, scratch_operands = 0 : i64, tpu.core_type = #tpu.core_type<tc>, window_params = [{transform_indices = @transform_0, window_bounds = array<i64: 2, 128>}, {pipeline_mode = #tpu.pipeline_mode<synchronous>, transform_indices = @transform_1, window_bounds = array<i64: 48, 64>}, {pipeline_mode = #tpu.pipeline_mode<synchronous>, transform_indices = @transform_2, window_bounds = array<i64: 48, 48>}, {transform_indices = @transform_3, window_bounds = array<i64: 1, 128>}]} {
    %c0 = arith.constant 0 : index
    %c0_0 = arith.constant 0 : index
    %0 = vector.load %arg1[%c0, %c0_0] : memref<2x128xi32, #tpu.memory_space<vmem>>, vector<1x128xi32>
    %c1 = arith.constant 1 : index
    %c0_1 = arith.constant 0 : index
    %1 = vector.load %arg1[%c1, %c0_1] : memref<2x128xi32, #tpu.memory_space<vmem>>, vector<1x128xi32>
    %2 = tpu.iota {dimensions = array<i32: 0>} : vector<64x128xi32>
    %3 = vector.broadcast %0 : vector<1x128xi32> to vector<64x128xi32>
    %4 = arith.cmpi eq, %2, %3 : vector<64x128xi32>
    %5 = arith.extui %4 : vector<64x128xi1> to vector<64x128xi32>
    %6 = arith.sitofp %5 : vector<64x128xi32> to vector<64x128xf32>
    %7 = arith.truncf %6 : vector<64x128xf32> to vector<64x128xbf16>
    %8 = tpu.iota {dimensions = array<i32: 0>} : vector<48x128xi32>
    %9 = vector.broadcast %1 : vector<1x128xi32> to vector<48x128xi32>
    %10 = arith.cmpi eq, %8, %9 : vector<48x128xi32>
    %11 = arith.extui %10 : vector<48x128xi1> to vector<48x128xi32>
    %12 = arith.sitofp %11 : vector<48x128xi32> to vector<48x128xf32>
    %13 = arith.truncf %12 : vector<48x128xf32> to vector<48x128xbf16>
    %c0_2 = arith.constant 0 : index
    %c0_3 = arith.constant 0 : index
    %14 = vector.load %arg2[%c0_2, %c0_3] : memref<48x64xbf16, #tpu.memory_space<vmem>>, vector<48x64xbf16>
    %cst = arith.constant dense<0.000000e+00> : vector<48x128xf32>
    %15 = tpu.matmul %14, %7, %cst {dimension_numbers = #tpu.dot_dimension_numbers<[1], [0], [0], [1], [0, 0, 1, 1], [], []>} : vector<48x64xbf16>, vector<64x128xbf16>, vector<48x128xf32> -> vector<48x128xf32>
    %c0_4 = arith.constant 0 : index
    %c0_5 = arith.constant 0 : index
    %16 = vector.load %arg3[%c0_4, %c0_5] : memref<48x48xbf16, #tpu.memory_space<vmem>>, vector<48x48xbf16>
    %cst_6 = arith.constant dense<0.000000e+00> : vector<48x128xf32>
    %17 = tpu.matmul %16, %13, %cst_6 {dimension_numbers = #tpu.dot_dimension_numbers<[1], [0], [0], [1], [0, 0, 1, 1], [], []>} : vector<48x48xbf16>, vector<48x128xbf16>, vector<48x128xf32> -> vector<48x128xf32>
    %18 = arith.mulf %15, %17 : vector<48x128xf32>
    %cst_7 = arith.constant dense<0.000000e+00> : vector<128xf32>
    %19 = vector.multi_reduction <add>, %18, %cst_7 [0] : vector<48x128xf32> to vector<128xf32>
    %20 = vector.shape_cast %19 : vector<128xf32> to vector<1x128xf32>
    %c0_8 = arith.constant 0 : index
    %c0_9 = arith.constant 0 : index
    %21 = vector.load %arg4[%c0_8, %c0_9] : memref<1x128xf32, #tpu.memory_space<vmem>>, vector<1x128xf32>
    tpu.vector_store %arg4[%c0_8, %c0_9], %20 {strides = array<i32>} : memref<1x128xf32, #tpu.memory_space<vmem>>, vector<1x128xf32>,
    return
  }
  func.func @transform_0(%arg0: i32) -> (i32, i32) {
    %c0_i32 = arith.constant 0 : i32
    %c0_i32_0 = arith.constant 0 : i32
    return %c0_i32, %arg0 : i32, i32
  }
  func.func @transform_1(%arg0: i32) -> (i32, i32) {
    %c0_i32 = arith.constant 0 : i32
    %c0_i32_0 = arith.constant 0 : i32
    %c0_i32_1 = arith.constant 0 : i32
    return %c0_i32, %c0_i32_0 : i32, i32
  }
  func.func @transform_2(%arg0: i32) -> (i32, i32) {
    %c0_i32 = arith.constant 0 : i32
    %c0_i32_0 = arith.constant 0 : i32
    %c0_i32_1 = arith.constant 0 : i32
    return %c0_i32, %c0_i32_0 : i32, i32
  }
  func.func @transform_3(%arg0: i32) -> (i32, i32) {
    %c0_i32 = arith.constant 0 : i32
    %c0_i32_0 = arith.constant 0 : i32
    return %c0_i32, %arg0 : i32, i32
  }
}

</mosaic_0001>

<bundles_post_ra>
// kernel: tpu_custom_call.1
= control target key start
LH: loop header
LB: loop body
LE: loop exit
PB: predicated region body
PF: predicated region fallthrough
CT: control target
= control target key end

     0   :  { %8 = vsyncpa [#allocation3], 0  ;;  %s640_s0 = inlined_call_operand.hbm [shape: s32[2,128], index: 0, kind: input, shape index: {}]   ;;  %s641_s1 = inlined_call_operand.hbm [shape: bf16[48,64], index: 1, kind: input, shape index: {}]   ;;  %s642_s2 = inlined_call_operand.hbm [shape: bf16[48,48], index: 2, kind: input, shape index: {}]   ;;  %s643_s3 = inlined_call_operand.hbm [shape: f32[1,128], index: 3, kind: output, shape index: {}]  }
   0x1   :  { %9 = vsyncpa [#allocation6], 0 }
   0x2   :  { %10 = vsyncpa [#allocation4], 0  ;;  %s535_s12 = smov [#allocation5]   ;;  %s441_s16 = scalar_lea.hbm %s641_s1, 384 }
   0x3   :  { %s26_s13 = sshll.u32 %s535_s12, 4  ;;  %p442_p0 = scmp.ne.s32.totalorder %s641_s1, %s441_s16  ;;  %s27_s13 = int_to_ptr.vmem [resolvable:$true] %s26_s13 }
   0x4   :  { %p445_p1 = scmp.lt.u32.totalorder %s441_s16, %s641_s1 }
   0x6   :  { %p447_p2 = pnand %p445_p1, %p442_p0 }
   0x8   :  { %450 = shalt.err (!%p447_p2)
}
   0x9   :  { %s451_s21 = scalar_lea.vmem %s27_s13, 384  ;;  %p456_p4 = scmp.lt.s32.totalorder %s27_s13, %s27_s13 }
   0xa   :  { %p452_p3 = scmp.ne.s32.totalorder %s27_s13, %s451_s21  ;;  %p457_p5 = scmp.lt.s32.totalorder %s451_s21, %s451_s21 }
   0xc   :  { %p458_p6 = por %p457_p5, %p456_p4 }
   0xe   :  { %p459_p7 = pnand %p458_p6, %p452_p3 }
  0x10   :  { %462 = shalt.err (!%p459_p7)
}
  0x11   :  { %s536_s22 = smov 64   ;;  %s537_s23 = smov 4  }
  0x12   :  { %32 = dma.hbm_to_vmem [thread:$0]  %s641_s1, 384, %s27_s13, [#allocation6], %s536_s22, %s536_s22, %s537_s23  }
  0x13   :  { %s538_s26 = smov [#allocation2]   ;;  %s539_s28 = smov [#allocation7]  }
  0x14   :  { %s17_s27 = sshll.u32 %s538_s26, 4  ;;  %s38_s29 = sshll.u32 %s539_s28, 4  ;;  %s18_s27 = int_to_ptr.vmem [resolvable:$true] %s17_s27  ;;  %s39_s29 = int_to_ptr.vmem [resolvable:$true] %s38_s29 }
  0x15   :  { %s463_s5 = scalar_lea.hbm %s640_s0, 32 }
  0x16   :  { %p464_p8 = scmp.ne.s32.totalorder %s640_s0, %s463_s5  ;;  %p467_p9 = scmp.lt.u32.totalorder %s463_s5, %s640_s0 }
  0x18   :  { %p469_p10 = pnand %p467_p9, %p464_p8 }
  0x1a   :  { %472 = shalt.err (!%p469_p10)
}
  0x1b   :  { %s473_s1 = scalar_lea.vmem %s18_s27, 32  ;;  %p478_p12 = scmp.lt.s32.totalorder %s18_s27, %s18_s27 }
  0x1c   :  { %p474_p11 = scmp.ne.s32.totalorder %s18_s27, %s473_s1  ;;  %p479_p13 = scmp.lt.s32.totalorder %s473_s1, %s473_s1 }
  0x1e   :  { %p480_p0 = por %p479_p13, %p478_p12 }
  0x20   :  { %p481_p1 = pnand %p480_p0, %p474_p11 }
  0x22   :  { %484 = shalt.err (!%p481_p1)
}
  0x23   :  { %20 = dma.hbm_to_vmem [thread:$0]  %s640_s0, 32, %s18_s27, [#allocation3]  }
  0x24   :  { %s485_s14 = scalar_lea.hbm %s642_s2, 384 }
  0x25   :  { %p486_p2 = scmp.ne.s32.totalorder %s642_s2, %s485_s14  ;;  %p489_p3 = scmp.lt.u32.totalorder %s485_s14, %s642_s2 }
  0x27   :  { %p491_p4 = pnand %p489_p3, %p486_p2 }
  0x29   :  { %494 = shalt.err (!%p491_p4)
}
  0x2a   :  { %s495_s19 = scalar_lea.vmem %s39_s29, 384  ;;  %p500_p6 = scmp.lt.s32.totalorder %s39_s29, %s39_s29 }
  0x2b   :  { %p496_p5 = scmp.ne.s32.totalorder %s39_s29, %s495_s19  ;;  %p501_p7 = scmp.lt.s32.totalorder %s495_s19, %s495_s19 }
  0x2d   :  { %p502_p8 = por %p501_p7, %p500_p6 }
  0x2f   :  { %p503_p9 = pnand %p502_p8, %p496_p5 }
  0x31   :  { %506 = shalt.err (!%p503_p9)
}
  0x32   :  { %44 = dma.hbm_to_vmem [thread:$0]  %s642_s2, 384, %s39_s29, [#allocation6], %s536_s22, %s536_s22, %s537_s23  }
  0x33   :  { %529 = dma.done.wait [#allocation3], 32  }
  0x34   :  { %530 = vsyncadd [#allocation3], 4294967264 }
  0x35   :  { %531 = dma.done.wait [#allocation6], 768  }
  0x36   :  { %532 = vsyncadd [#allocation6], 4294966528  ;;  %v57_v0 = vlaneseq  ;;  %v540_v1 = vmov 0.0   ;;  %vm541_vm0 = vmmov 0   ;;  %v333_v8 = vld [vmem:[#allocation2] ss:$0 sm:$0xff] }
  0x37   :  { %388 = vmatprep.subr.bf16.mxu0 %v540_v1  ;;  %408 = vmatprep.subr.bf16.mxu1 %v540_v1  ;;  %v342_v9 = vld [vmem:[#allocation2 + $0x1] ss:$0 sm:$0xff]  ;;  %v542_v10 = vmov 1.0|1.0   ;;  %v436_v14 = vld [vmem:[#allocation5] sm:$0xff]   ;;  %v438_v16 = vld [vmem:[#allocation5 + $0x8] sm:$0xff]  }
  0x38   :  { %v58_v2 = vshrl.u32 %v57_v0, 7  ;;  %414 = vmatprep.mubr.msk.bf16.mxu1 %vm541_vm0, %v540_v1  ;;  %396 = vmatprep.mubr.msk.bf16.mxu0 %vm541_vm0, %v540_v1  ;;  %v435_v13 = vld [vmem:[#allocation7] sm:$0xff]   ;;  %v437_v15 = vld [vmem:[#allocation7 + $0x8] sm:$0xff]   ;;  %v439_v17 = vld [vmem:[#allocation7 + $0x10] sm:$0xff]   ;;  %s543_s2 = smov [#allocation8]  }
  0x39   :  { %v440_v18 = vld [vmem:[#allocation5 + $0x10] sm:$0xff]   ;;  %s323_s21 = sshll.u32 %s543_s2, 4  ;;  %s324_s21 = int_to_ptr.vmem [resolvable:$true] %s323_s21 }
  0x3a   :  { %v59_v3 = vadd.s32 8, %v58_v2  ;;  %v60_v4 = vadd.s32 16, %v58_v2  ;;  %v61_v5 = vadd.s32 24, %v58_v2  ;;  %v62_v6 = vadd.s32 32, %v58_v2  ;;  %s507_s22 = scalar_lea.vmem %s324_s21, 16  ;;  %s511_s23 = scalar_lea.vmem %s324_s21, 32 }
  0x3b   :  { %v63_v7 = vadd.s32 40, %v58_v2  ;;  %vm70_vm1 = vcmp.eq.s32.totalorder %v58_v2, %v333_v8  ;;  %vm102_vm3 = vcmp.eq.s32.totalorder %v58_v2, %v342_v9  ;;  %v64_v11 = vadd.s32 48, %v58_v2  ;;  %p508_p10 = scmp.ne.s32.totalorder %s324_s21, %s507_s22  ;;  %p512_p11 = scmp.lt.s32.totalorder %s324_s21, %s324_s21 }
  0x3c   :  { %vm71_vm2 = vcmp.eq.s32.totalorder %v59_v3, %v333_v8  ;;  %vm103_vm4 = vcmp.eq.s32.totalorder %v59_v3, %v342_v9  ;;  %vm72_vm6 = vcmp.eq.s32.totalorder %v60_v4, %v333_v8  ;;  %vm73_vm7 = vcmp.eq.s32.totalorder %v61_v5, %v333_v8  ;;  %p513_p12 = scmp.lt.s32.totalorder %s511_s23, %s507_s22 }
  0x3d   :  { %vm352_vm5 = vmpackc.low %vm71_vm2, %vm70_vm1  ;;  %vm104_vm8 = vcmp.eq.s32.totalorder %v60_v4, %v342_v9  ;;  %vm105_vm9 = vcmp.eq.s32.totalorder %v61_v5, %v342_v9  ;;  %vm74_vm13 = vcmp.eq.s32.totalorder %v62_v6, %v333_v8  ;;  %vm75_vm14 = vcmp.eq.s32.totalorder %v63_v7, %v333_v8 }
  0x3e   :  { %389 = vmatpush3.bf16.msk.msra.mxu0 %vm352_vm5, %v542_v10  ;;  %vm366_vm10 = vmpackc.low %vm103_vm4, %vm102_vm3  ;;  %v65_v12 = vadd.s32 56, %v58_v2  ;;  %vm106_vm15 = vcmp.eq.s32.totalorder %v62_v6, %v342_v9  ;;  %vm107_vm1 = vcmp.eq.s32.totalorder %v63_v7, %v342_v9  ;;  %vm76_vm4 = vcmp.eq.s32.totalorder %v64_v11, %v333_v8  ;;  %p514_p13 = por %p513_p12, %p512_p11 }
  0x3f   :  { %409 = vmatpush3.bf16.msk.msra.mxu1 %vm366_vm10, %v542_v10  ;;  %390 = vmatprep.subr.bf16.mxu0 %v540_v1  ;;  %vm354_vm11 = vmpackc.low %vm73_vm7, %vm72_vm6  ;;  %vm232_vm7 = vcmask 392192  }
  0x40   :  { %410 = vmatprep.subr.bf16.mxu1 %v540_v1  ;;  %vm368_vm12 = vmpackc.low %vm105_vm9, %vm104_vm8  ;;  %vm77_vm5 = vcmp.eq.s32.totalorder %v65_v12, %v333_v8  ;;  %vm144_vm8 = vcmask 523264   ;;  %p515_p0 = pnand %p514_p13, %p508_p10 }
  0x41   :  { %vm356_vm2 = vmpackc.low %vm75_vm14, %vm74_vm13 }
  0x42   :  { %391 = vmatpush3.bf16.msk.msra.mxu0 %vm354_vm11, %v542_v10  ;;  %vm370_vm3 = vmpackc.low %vm107_vm1, %vm106_vm15 }
  0x43   :  { %411 = vmatpush3.bf16.msk.msra.mxu1 %vm368_vm12, %v542_v10  ;;  %392 = vmatprep.subr.bf16.mxu0 %v540_v1  ;;  %vm358_vm6 = vmpackc.low %vm77_vm5, %vm76_vm4 }
  0x44   :  { %412 = vmatprep.subr.bf16.mxu1 %v540_v1 }
  0x46   :  { %393 = vmatpush3.bf16.msk.msra.mxu0 %vm356_vm2, %v542_v10 }
  0x47   :  { %413 = vmatpush3.bf16.msk.msra.mxu1 %vm370_vm3, %v542_v10  ;;  %394 = vmatprep.subr.bf16.mxu0 %v540_v1 }
  0x4a   :  { %395 = vmatpush3.bf16.msk.msra.mxu0 %vm358_vm6, %v542_v10  ;;  %415 = vmatmul.mubr.msk.bf16.vlgmr.msra.gmra.mrb[0].mxu1 %vm232_vm7, %v435_v13 }
  0x4b   :  { %418 = vmatprep.mubr.msk.bf16.mxu1 %vm541_vm0, %v540_v1 }
  0x4d   :  { %397 = vmatmul.mubr.msk.bf16.vlgmr.msra.gmra.mrb[0].mxu0 %vm144_vm8, %v436_v14 }
  0x4e   :  { %400 = vmatprep.mubr.msk.bf16.mxu0 %vm541_vm0, %v540_v1 }
  0x52   :  { %419 = vmatmul.mubr.msk.bf16.gmra.mrb[4].mxu1 %vm232_vm7, %v437_v15 }
  0x53   :  { %422 = vmatprep.mubr.msk.bf16.mxu1 %vm541_vm0, %v540_v1 }
  0x55   :  { %401 = vmatmul.mubr.msk.bf16.gmra.mrb[4].mxu0 %vm144_vm8, %v438_v16 }
  0x56   :  { %404 = vmatprep.mubr.msk.bf16.mxu0 %vm541_vm0, %v540_v1 }
  0x5a   :  { %423 = vmatmul.mubr.msk.bf16.gmra.mrb[8].mxu1 %vm232_vm7, %v439_v17 }
  0x5d   :  { %405 = vmatmul.mubr.msk.bf16.gmra.mrb[8].mxu0 %vm144_vm8, %v440_v18 }
 0x11d   :  { %v276_v19 = vpop.f32.mrb[0].mxu1 }
 0x11e   :  { %v416_v20 = vpop.f32.mrb[1].mxu1 }
 0x11f   :  { %v279_v21 = vpop.f32.mrb[2].mxu1 }
 0x120   :  { %v188_v22 = vpop.f32.mrb[0].mxu0  ;;  %v417_v23 = vpop.f32.mrb[3].mxu1 }
 0x121   :  { %v299_v24 = vmul.f32 %v276_v19, %v188_v22  ;;  %v398_v25 = vpop.f32.mrb[1].mxu0 }
 0x122   :  { %v191_v26 = vpop.f32.mrb[2].mxu0 }
 0x123   :  { %v300_v27 = vmul.f32 %v279_v21, %v191_v26  ;;  %v399_v28 = vpop.f32.mrb[3].mxu0 }
 0x125   :  { %v305_v29 = vadd.f32 %v300_v27, %v299_v24  ;;  %v284_v30 = vpop.f32.mrb[4].mxu1 }
 0x126   :  { %v420_v31 = vpop.f32.mrb[5].mxu1 }
 0x127   :  { %v287_v32 = vpop.f32.mrb[6].mxu1 }
 0x128   :  { %v196_v33 = vpop.f32.mrb[4].mxu0  ;;  %v421_v34 = vpop.f32.mrb[7].mxu1 }
 0x129   :  { %v301_v35 = vmul.f32 %v284_v30, %v196_v33  ;;  %v402_v36 = vpop.f32.mrb[5].mxu0 }
 0x12a   :  { %v199_v37 = vpop.f32.mrb[6].mxu0 }
 0x12b   :  { %v306_v38 = vadd.f32 %v305_v29, %v301_v35  ;;  %v302_v39 = vmul.f32 %v287_v32, %v199_v37  ;;  %v403_v40 = vpop.f32.mrb[7].mxu0 }
 0x12d   :  { %v307_v41 = vadd.f32 %v306_v38, %v302_v39  ;;  %v292_v42 = vpop.f32.mrb[8].mxu1 }
 0x12e   :  { %v424_v43 = vpop.f32.mrb[9].mxu1 }
 0x12f   :  { %v295_v44 = vpop.f32.mrb[10].mxu1 }
 0x130   :  { %v204_v45 = vpop.f32.mrb[8].mxu0  ;;  %v425_v46 = vpop.f32.mrb[11].mxu1 }
 0x131   :  { %v303_v47 = vmul.f32 %v292_v42, %v204_v45  ;;  %v406_v48 = vpop.f32.mrb[9].mxu0 }
 0x132   :  { %v207_v49 = vpop.f32.mrb[10].mxu0 }
 0x133   :  { %v308_v50 = vadd.f32 %v307_v41, %v303_v47  ;;  %v304_v51 = vmul.f32 %v295_v44, %v207_v49  ;;  %v407_v52 = vpop.f32.mrb[11].mxu0 }
 0x135   :  { %v309_v53 = vadd.f32 %v308_v50, %v304_v51 }
 0x137   :  { %v310_v54 = vrot.slane %v309_v53, 4 }
 0x139   :  { %v311_v55 = vadd.f32 %v310_v54, %v309_v53 }
 0x13b   :  { %v312_v56 = vrot.slane %v311_v55, 2 }
 0x13d   :  { %v313_v57 = vadd.f32 %v312_v56, %v311_v55 }
 0x13f   :  { %v314_v58 = vrot.slane %v313_v57, 1 }
 0x141   :  { %v315_v59 = vadd.f32 %v314_v58, %v313_v57 }
 0x143   :  { %316 = vst [vmem:[#allocation8] sm:$0x1] %v315_v59 }
 0x144   :  { %518 = shalt.err (!%p515_p0)
}
 0x145   :  { %s519_s26 = scalar_lea.hbm %s643_s3, 16 }
 0x146   :  { %p520_p1 = scmp.ne.s32.totalorder %s643_s3, %s519_s26  ;;  %p523_p2 = scmp.lt.u32.totalorder %s519_s26, %s643_s3 }
 0x148   :  { %p525_p3 = pnand %p523_p2, %p520_p1 }
 0x14a   :  { %528 = shalt.err (!%p525_p3)
}
 0x14b   :  { %326 = dma.vmem_to_hbm [thread:$0]  %s324_s21, 16, %s643_s3, [#allocation4]  }
 0x14c   :  { %533 = dma.done.wait [#allocation4], 16  }
 0x14d   :  { %534 = vsyncadd [#allocation4], 4294967280 }
 0x14e   :  { %330 = vsyncpa [#allocation3], 1 }
 0x14f   :  { %331 = vsyncpa [#allocation6], 1 }
 0x150   :  { %332 = vsyncpa [#allocation4], 1 }

</bundles_post_ra>
